<compile_context>
chip_gen: v7x
topology: tpu7x:2x2x1
jax: 0.10.0
libtpu: 0.0.40
codegen_flags: <defaults>
</compile_context>

<pallas_src>
import functools

import jax
import jax.numpy as jnp
from jax.experimental import pallas as pl
from jax.experimental.pallas import tpu as pltpu


def _fused_kernel(x_ref, w_ref, g_ref, b_ref, o_ref,
                  sum_ref, sq_ref, ws_ref, shift_ref,
                  *, eps, count, block_s, s_total, resident, mask_tail):
    """Grid = (pass, n, s_tile).
    Blocks: x (Cin, block_s) streaming OR (N, Cin, S) resident, w (Cout, Cin),
    g/b (Cout, 1), out (Cout, block_s).
    Scratch: sum/sq/shift (Cout, 1), scale-folded weights ws (Cout, Cin)."""
    p = pl.program_id(0)   # 0: statistics pass, 1: normalize pass
    n = pl.program_id(1)   # batch sample
    s = pl.program_id(2)   # spatial tile
    first_tile = (n == 0) & (s == 0)

    w = w_ref[...]                                     # (Cout, Cin), f32

    # One-time scratch init (runs before anything reads ws_ref / shift_ref).
    @pl.when((p == 0) & first_tile)
    def _():
        sum_ref[...] = jnp.zeros_like(sum_ref)
        sq_ref[...] = jnp.zeros_like(sq_ref)
        ws_ref[...] = w
        shift_ref[...] = jnp.zeros_like(shift_ref)

    # Pass-1 prologue: fold the batch statistics into scale/shift exactly once.
    #   scale = gamma * rsqrt(var + eps);  W' = scale * W;  shift = beta - mean*scale
    @pl.when((p == 1) & first_tile)
    def _():
        mean = sum_ref[...] / count
        # TODO(synk): E[y^2]-E[y]^2 in f32 is cancellation-prone for very large N*S;
        # a Welford / mean-shifted accumulation would be more robust.
        var = jnp.maximum(sq_ref[...] / count - mean * mean, 0.0)
        scale = g_ref[...] * jax.lax.rsqrt(var + eps)   # (Cout, 1)
        ws_ref[...] = w * scale                         # row-scaled weights W'
        shift_ref[...] = b_ref[...] - mean * scale      # (Cout, 1)

    # Load the x tile (channels on sublanes, spatial on lanes); math in f32.
    if resident:
        # x_ref is the whole (N, Cin, S) slab, resident in VMEM across both passes.
        x = x_ref[n].astype(jnp.float32)                # (Cin, block_s == S)
    else:
        x = x_ref[...].astype(jnp.float32)              # (Cin, block_s)
    cin = x.shape[0]

    # Pass 0 needs the raw conv output for the statistics; pass 1 uses the
    # scale-folded weights so the hot path is Cin FMAs + a single add.
    w_eff = jnp.where(p == 1, ws_ref[...], w)           # tiny (Cout, Cin) select

    # 1x1x1 conv as Cin broadcast-FMAs on the VPU (lane-dense).
    y = w_eff[:, 0:1] * x[0:1, :]                       # (Cout, block_s)
    for ci in range(1, cin):
        y = y + w_eff[:, ci:ci + 1] * x[ci:ci + 1, :]

    # ---- pass 0: accumulate per-channel statistics of y ---------------------
    @pl.when(p == 0)
    def _():
        if mask_tail:
            lane = jax.lax.broadcasted_iota(jnp.int32, y.shape, 1)
            valid = jnp.minimum(s_total - s * block_s, block_s)
            m = lane < valid
            ys = jnp.where(m, y, 0.0)
            y2 = jnp.where(m, y * y, 0.0)
        else:
            ys, y2 = y, y * y
        sum_ref[...] += jnp.sum(ys, axis=1, keepdims=True)
        sq_ref[...] += jnp.sum(y2, axis=1, keepdims=True)

    # ---- pass 1: normalized output (scale already folded into W') -----------
    @pl.when(p == 1)
    def _():
        o_ref[...] = (y + shift_ref[...]).astype(o_ref.dtype)


def _plan_tiling(S, N, cin, cout, itemsize):
    """Pick (block_s, resident, vmem_limit_bytes) with generation-aware VMEM budget."""
    itemsize = max(int(itemsize), 1)
    try:
        info = pltpu.get_tpu_info()
        vmem_cap = int(getattr(info, "vmem_capacity_bytes", 0)) or (64 << 20)
    except Exception:
        vmem_cap = 64 << 20                      # conservative (v7x per-core)

    # Effective per-lane-column footprint of one grid step:
    #   2x double-buffered x block + 2x double-buffered out block (native dtype)
    #   + ~3 f32 temporaries over (cin+cout) rows (x cast, FMA chain, y*y / selects).
    per_lane = 2 * (cin + cout) * itemsize + 3 * (cin + cout) * 4
    budget = min(vmem_cap // 8, 16 << 20)        # ~8 MiB on v7x, 16 MiB on v5e/v6e
    cap = max(128, (budget // per_lane) // 128 * 128)

    if S <= 128:
        block_s = S                              # full spatial dim: always legal
    else:
        block_s = min(cap, (S // 128) * 128)
        # Prefer a multiple-of-128 divisor of S near the cap: avoids a masked /
        # partial tail block without giving up much tile size.
        best = 0
        for d in range(128, block_s + 1, 128):
            if S % d == 0:
                best = d
        if best >= block_s // 2:
            block_s = best
        # Ragged-but-small S: a single full-S tile is legal (block dim == array dim)
        # and removes both the masked tail and the extra tiles.
        if block_s < S and per_lane * S <= budget:
            block_s = S

    # Resident-x fast path: hold the whole x slab in VMEM for both passes so x is
    # read from HBM once instead of twice.  Only taken when one spatial tile covers
    # all of S (keeps the in-kernel read a plain x_ref[n]).
    resident = False
    if block_s == S:
        x_res = 2 * N * cin * S * itemsize       # assume double-buffered worst case
        step = per_lane * S
        if 2 * (x_res + step + (2 << 20)) <= max(vmem_cap - (8 << 20), 0):
            resident = True

    est = per_lane * block_s + (1 << 20)
    if resident:
        est += 2 * N * cin * S * itemsize
    vmem_limit = int(min(vmem_cap - (8 << 20), max(2 * est, 32 << 20)))
    vmem_limit = max(vmem_limit, 16 << 20)
    return block_s, resident, vmem_limit


def conv_norm_act_3d(x, weight, gamma, beta, *, eps=1e-5, block_s=None):
    """x: (N, Cin, D, H, W)  weight: (Cout, Cin, 1, 1, 1)  gamma/beta: (Cout,)."""
    N, Cin, D, H, W = x.shape
    Cout = weight.shape[0]
    S = D * H * W
    count = float(N * S)

    # Pure views of the NCDHW layout -- no transposes, no extra HBM traffic.
    xv = x.reshape(N, Cin, S)
    wm = weight.reshape(Cout, Cin).astype(jnp.float32)
    g = gamma.reshape(Cout, 1).astype(jnp.float32)
    b = beta.reshape(Cout, 1).astype(jnp.float32)

    itemsize = jnp.dtype(x.dtype).itemsize
    auto_block_s, resident, vmem_limit = _plan_tiling(S, N, Cin, Cout, itemsize)
    if block_s is None:
        block_s = auto_block_s
    else:
        resident = resident and (block_s == S)
    s_tiles = pl.cdiv(S, block_s)
    mask_tail = (S % block_s) != 0
    grid = (2, N, s_tiles)              # pass axis outermost: all stats, then normalize

    if resident:
        # Constant-index full-array block: fetched from HBM exactly once, lives in
        # VMEM across both passes.
        x_spec = pl.BlockSpec((N, Cin, S), lambda p, n, s: (0, 0, 0))
    else:
        x_spec = pl.BlockSpec((None, Cin, block_s), lambda p, n, s: (n, 0, s))

    kernel = functools.partial(
        _fused_kernel, eps=eps, count=count, block_s=block_s, s_total=S,
        resident=resident, mask_tail=mask_tail)

    out = pl.pallas_call(
        kernel,
        out_shape=jax.ShapeDtypeStruct((N, Cout, S), x.dtype),
        grid=grid,
        in_specs=[
            x_spec,
            pl.BlockSpec((Cout, Cin), lambda p, n, s: (0, 0)),
            pl.BlockSpec((Cout, 1), lambda p, n, s: (0, 0)),
            pl.BlockSpec((Cout, 1), lambda p, n, s: (0, 0)),
        ],
        # Pinned to block (0,0,0) during pass 0 (p==0) so the never-written output
        # buffer is not flushed until pass 1 fills it; during pass 1 it follows (n, s).
        out_specs=pl.BlockSpec((None, Cout, block_s),
                               lambda p, n, s: (p * n, 0, p * s)),
        scratch_shapes=[
            pltpu.VMEM((Cout, 1), jnp.float32),      # per-channel sum(y)
            pltpu.VMEM((Cout, 1), jnp.float32),      # per-channel sum(y*y)
            pltpu.VMEM((Cout, Cin), jnp.float32),    # scale-folded weights W'
            pltpu.VMEM((Cout, 1), jnp.float32),      # shift = beta - mean*scale
        ],
        compiler_params=pltpu.CompilerParams(
            dimension_semantics=("arbitrary", "arbitrary", "arbitrary"),
            vmem_limit_bytes=vmem_limit),
    )(xv, wm, g, b)

    return out.reshape(N, Cout, D, H, W)


if __name__ == "__main__":
    # Small shapes consistent with the module: batch=2, in_ch=4, out_ch=8, spatial=8^3.
    N, Cin, Cout, D, H, W = 2, 4, 8, 8, 8, 8
    key = jax.random.PRNGKey(0)
    kx, kw = jax.random.split(key)

    x = jax.random.normal(kx, (N, Cin, D, H, W), dtype=jnp.float32)
    weight = jax.random.normal(kw, (Cout, Cin, 1, 1, 1), dtype=jnp.float32) * 0.1
    gamma = jnp.ones((Cout,), dtype=jnp.float32)   # BatchNorm3d default init
    beta = jnp.zeros((Cout,), dtype=jnp.float32)

    out = conv_norm_act_3d(x, weight, gamma, beta)
    out = jax.block_until_ready(out)

    # Pure-JAX reference: 1x1x1 conv == channel mix, then training-mode (biased) BN.
    xf = x.reshape(N, Cin, -1)
    y_ref = jnp.einsum("oc,ncs->nos", weight.reshape(Cout, Cin), xf)
    mean = y_ref.mean(axis=(0, 2), keepdims=True)
    var = y_ref.var(axis=(0, 2), keepdims=True)
    ref = (y_ref - mean) / jnp.sqrt(var + 1e-5)
    ref = ref * gamma[None, :, None] + beta[None, :, None]
    ref = ref.reshape(N, Cout, D, H, W)

    assert out.shape == (N, Cout, D, H, W)
    assert jnp.allclose(out, ref, atol=1e-4, rtol=1e-4), float(jnp.max(jnp.abs(out - ref)))
    print("KERNEL_OK")
</pallas_src>

<mosaic_0001>
module attributes {stable_mosaic.version = 11 : i64} {
  func.func @_fused_kernel(%arg0: i32, %arg1: i32, %arg2: i32, %arg3: memref<2x4x512xf32, #tpu.memory_space<vmem>>, %arg4: memref<8x4xf32, #tpu.memory_space<vmem>>, %arg5: memref<8x1xf32, #tpu.memory_space<vmem>>, %arg6: memref<8x1xf32, #tpu.memory_space<vmem>>, %arg7: memref<1x8x512xf32, #tpu.memory_space<vmem>>, %arg8: memref<8x1xf32, #tpu.memory_space<vmem>>, %arg9: memref<8x1xf32, #tpu.memory_space<vmem>>, %arg10: memref<8x4xf32, #tpu.memory_space<vmem>>, %arg11: memref<8x1xf32, #tpu.memory_space<vmem>>) attributes {dimension_semantics = [#tpu.dimension_semantics<arbitrary>, #tpu.dimension_semantics<arbitrary>, #tpu.dimension_semantics<arbitrary>], iteration_bounds = array<i64: 2, 2, 1>, scalar_prefetch = 0 : i64, scratch_operands = 4 : i64, tpu.core_type = #tpu.core_type<tc>, window_params = [{pipeline_mode = #tpu.pipeline_mode<synchronous>, transform_indices = @transform_0, window_bounds = array<i64: 2, 4, 512>}, {pipeline_mode = #tpu.pipeline_mode<synchronous>, transform_indices = @transform_1, window_bounds = array<i64: 8, 4>}, {pipeline_mode = #tpu.pipeline_mode<synchronous>, transform_indices = @transform_2, window_bounds = array<i64: 8, 1>}, {pipeline_mode = #tpu.pipeline_mode<synchronous>, transform_indices = @transform_3, window_bounds = array<i64: 8, 1>}, {transform_indices = @transform_4, window_bounds = array<i64: 1, 8, 512>}]} {
    %c0_i32 = arith.constant 0 : i32
    %0 = arith.cmpi eq, %arg1, %c0_i32 : i32
    %c0_i32_0 = arith.constant 0 : i32
    %1 = arith.cmpi eq, %arg2, %c0_i32_0 : i32
    %2 = arith.andi %0, %1 : i1
    %c0 = arith.constant 0 : index
    %c0_1 = arith.constant 0 : index
    %3 = vector.load %arg4[%c0, %c0_1] : memref<8x4xf32, #tpu.memory_space<vmem>>, vector<8x4xf32>
    %c0_i32_2 = arith.constant 0 : i32
    %4 = arith.cmpi eq, %arg0, %c0_i32_2 : i32
    %5 = arith.andi %4, %2 : i1
    %6 = arith.extui %5 : i1 to i32
    %c0_i32_3 = arith.constant 0 : i32
    %7 = arith.cmpi ne, %6, %c0_i32_3 : i32
    scf.if %7 {
      %cst = arith.constant 0.000000e+00 : f32
      %47 = vector.broadcast %cst : f32 to vector<8x1xf32>
      %c0_14 = arith.constant 0 : index
      %c0_15 = arith.constant 0 : index
      %48 = vector.load %arg8[%c0_14, %c0_15] : memref<8x1xf32, #tpu.memory_space<vmem>>, vector<8x1xf32>
      tpu.vector_store %arg8[%c0_14, %c0_15], %47 {strides = array<i32>} : memref<8x1xf32, #tpu.memory_space<vmem>>, vector<8x1xf32>,
      %cst_16 = arith.constant 0.000000e+00 : f32
      %49 = vector.broadcast %cst_16 : f32 to vector<8x1xf32>
      %c0_17 = arith.constant 0 : index
      %c0_18 = arith.constant 0 : index
      %50 = vector.load %arg9[%c0_17, %c0_18] : memref<8x1xf32, #tpu.memory_space<vmem>>, vector<8x1xf32>
      tpu.vector_store %arg9[%c0_17, %c0_18], %49 {strides = array<i32>} : memref<8x1xf32, #tpu.memory_space<vmem>>, vector<8x1xf32>,
      %c0_19 = arith.constant 0 : index
      %c0_20 = arith.constant 0 : index
      %51 = vector.load %arg10[%c0_19, %c0_20] : memref<8x4xf32, #tpu.memory_space<vmem>>, vector<8x4xf32>
      tpu.vector_store %arg10[%c0_19, %c0_20], %3 {strides = array<i32>} : memref<8x4xf32, #tpu.memory_space<vmem>>, vector<8x4xf32>,
      %cst_21 = arith.constant 0.000000e+00 : f32
      %52 = vector.broadcast %cst_21 : f32 to vector<8x1xf32>
      %c0_22 = arith.constant 0 : index
      %c0_23 = arith.constant 0 : index
      %53 = vector.load %arg11[%c0_22, %c0_23] : memref<8x1xf32, #tpu.memory_space<vmem>>, vector<8x1xf32>
      tpu.vector_store %arg11[%c0_22, %c0_23], %52 {strides = array<i32>} : memref<8x1xf32, #tpu.memory_space<vmem>>, vector<8x1xf32>,
    } else {
    }
    %c1_i32 = arith.constant 1 : i32
    %8 = arith.cmpi eq, %arg0, %c1_i32 : i32
    %9 = arith.andi %8, %2 : i1
    %10 = arith.extui %9 : i1 to i32
    %c0_i32_4 = arith.constant 0 : i32
    %11 = arith.cmpi ne, %10, %c0_i32_4 : i32
    scf.if %11 {
      %c0_14 = arith.constant 0 : index
      %c0_15 = arith.constant 0 : index
      %47 = vector.load %arg8[%c0_14, %c0_15] : memref<8x1xf32, #tpu.memory_space<vmem>>, vector<8x1xf32>
      %cst = arith.constant 1.024000e+03 : f32
      %48 = vector.broadcast %cst : f32 to vector<8x1xf32>
      %49 = arith.divf %47, %48 : vector<8x1xf32>
      %c0_16 = arith.constant 0 : index
      %c0_17 = arith.constant 0 : index
      %50 = vector.load %arg9[%c0_16, %c0_17] : memref<8x1xf32, #tpu.memory_space<vmem>>, vector<8x1xf32>
      %cst_18 = arith.constant 1.024000e+03 : f32
      %51 = vector.broadcast %cst_18 : f32 to vector<8x1xf32>
      %52 = arith.divf %50, %51 : vector<8x1xf32>
      %53 = arith.mulf %49, %49 : vector<8x1xf32>
      %54 = arith.subf %52, %53 : vector<8x1xf32>
      %cst_19 = arith.constant 0.000000e+00 : f32
      %55 = vector.broadcast %cst_19 : f32 to vector<8x1xf32>
      %56 = arith.maximumf %54, %55 : vector<8x1xf32>
      %c0_20 = arith.constant 0 : index
      %c0_21 = arith.constant 0 : index
      %57 = vector.load %arg5[%c0_20, %c0_21] : memref<8x1xf32, #tpu.memory_space<vmem>>, vector<8x1xf32>
      %cst_22 = arith.constant 9.99999974E-6 : f32
      %58 = vector.broadcast %cst_22 : f32 to vector<8x1xf32>
      %59 = arith.addf %56, %58 : vector<8x1xf32>
      %60 = math.rsqrt %59 : vector<8x1xf32>
      %61 = arith.mulf %57, %60 : vector<8x1xf32>
      %62 = vector.broadcast %61 : vector<8x1xf32> to vector<8x4xf32>
      %63 = arith.mulf %3, %62 : vector<8x4xf32>
      %c0_23 = arith.constant 0 : index
      %c0_24 = arith.constant 0 : index
      %64 = vector.load %arg10[%c0_23, %c0_24] : memref<8x4xf32, #tpu.memory_space<vmem>>, vector<8x4xf32>
      tpu.vector_store %arg10[%c0_23, %c0_24], %63 {strides = array<i32>} : memref<8x4xf32, #tpu.memory_space<vmem>>, vector<8x4xf32>,
      %c0_25 = arith.constant 0 : index
      %c0_26 = arith.constant 0 : index
      %65 = vector.load %arg6[%c0_25, %c0_26] : memref<8x1xf32, #tpu.memory_space<vmem>>, vector<8x1xf32>
      %66 = arith.mulf %49, %61 : vector<8x1xf32>
      %67 = arith.subf %65, %66 : vector<8x1xf32>
      %c0_27 = arith.constant 0 : index
      %c0_28 = arith.constant 0 : index
      %68 = vector.load %arg11[%c0_27, %c0_28] : memref<8x1xf32, #tpu.memory_space<vmem>>, vector<8x1xf32>
      tpu.vector_store %arg11[%c0_27, %c0_28], %67 {strides = array<i32>} : memref<8x1xf32, #tpu.memory_space<vmem>>, vector<8x1xf32>,
    } else {
    }
    %12 = arith.index_cast %arg1 : i32 to index
    %c0_5 = arith.constant 0 : index
    %c0_6 = arith.constant 0 : index
    %13 = vector.load %arg3[%12, %c0_5, %c0_6] : memref<2x4x512xf32, #tpu.memory_space<vmem>>, vector<1x4x512xf32>
    %14 = vector.shape_cast %13 : vector<1x4x512xf32> to vector<4x512xf32>
    %c1_i32_7 = arith.constant 1 : i32
    %15 = arith.cmpi eq, %arg0, %c1_i32_7 : i32
    %c0_8 = arith.constant 0 : index
    %c0_9 = arith.constant 0 : index
    %16 = vector.load %arg10[%c0_8, %c0_9] : memref<8x4xf32, #tpu.memory_space<vmem>>, vector<8x4xf32>
    %17 = arith.select %15, %16, %3 : vector<8x4xf32>
    %18 = vector.extract_strided_slice %17 {offsets = [0, 0], sizes = [8, 1], strides = [1, 1]} : vector<8x4xf32> to vector<8x1xf32>
    %19 = vector.extract_strided_slice %14 {offsets = [0, 0], sizes = [1, 512], strides = [1, 1]} : vector<4x512xf32> to vector<1x512xf32>
    %20 = vector.broadcast %18 : vector<8x1xf32> to vector<8x512xf32>
    %21 = vector.broadcast %19 : vector<1x512xf32> to vector<8x512xf32>
    %22 = arith.mulf %20, %21 : vector<8x512xf32>
    %23 = vector.extract_strided_slice %17 {offsets = [0, 1], sizes = [8, 1], strides = [1, 1]} : vector<8x4xf32> to vector<8x1xf32>
    %24 = vector.extract_strided_slice %14 {offsets = [1, 0], sizes = [1, 512], strides = [1, 1]} : vector<4x512xf32> to vector<1x512xf32>
    %25 = vector.broadcast %23 : vector<8x1xf32> to vector<8x512xf32>
    %26 = vector.broadcast %24 : vector<1x512xf32> to vector<8x512xf32>
    %27 = arith.mulf %25, %26 : vector<8x512xf32>
    %28 = arith.addf %22, %27 : vector<8x512xf32>
    %29 = vector.extract_strided_slice %17 {offsets = [0, 2], sizes = [8, 1], strides = [1, 1]} : vector<8x4xf32> to vector<8x1xf32>
    %30 = vector.extract_strided_slice %14 {offsets = [2, 0], sizes = [1, 512], strides = [1, 1]} : vector<4x512xf32> to vector<1x512xf32>
    %31 = vector.broadcast %29 : vector<8x1xf32> to vector<8x512xf32>
    %32 = vector.broadcast %30 : vector<1x512xf32> to vector<8x512xf32>
    %33 = arith.mulf %31, %32 : vector<8x512xf32>
    %34 = arith.addf %28, %33 : vector<8x512xf32>
    %35 = vector.extract_strided_slice %17 {offsets = [0, 3], sizes = [8, 1], strides = [1, 1]} : vector<8x4xf32> to vector<8x1xf32>
    %36 = vector.extract_strided_slice %14 {offsets = [3, 0], sizes = [1, 512], strides = [1, 1]} : vector<4x512xf32> to vector<1x512xf32>
    %37 = vector.broadcast %35 : vector<8x1xf32> to vector<8x512xf32>
    %38 = vector.broadcast %36 : vector<1x512xf32> to vector<8x512xf32>
    %39 = arith.mulf %37, %38 : vector<8x512xf32>
    %40 = arith.addf %34, %39 : vector<8x512xf32>
    %c0_i32_10 = arith.constant 0 : i32
    %41 = arith.cmpi eq, %arg0, %c0_i32_10 : i32
    %42 = arith.extui %41 : i1 to i32
    %c0_i32_11 = arith.constant 0 : i32
    %43 = arith.cmpi ne, %42, %c0_i32_11 : i32
    scf.if %43 {
      %47 = arith.mulf %40, %40 : vector<8x512xf32>
      %c0_14 = arith.constant 0 : index
      %c0_15 = arith.constant 0 : index
      %48 = vector.load %arg8[%c0_14, %c0_15] : memref<8x1xf32, #tpu.memory_space<vmem>>, vector<8x1xf32>
      %cst = arith.constant dense<0.000000e+00> : vector<8xf32>
      %49 = vector.multi_reduction <add>, %40, %cst [1] : vector<8x512xf32> to vector<8xf32>
      %50 = vector.shape_cast %49 : vector<8xf32> to vector<8x1xf32>
      %51 = arith.addf %48, %50 : vector<8x1xf32>
      %c0_16 = arith.constant 0 : index
      %c0_17 = arith.constant 0 : index
      %52 = vector.load %arg8[%c0_16, %c0_17] : memref<8x1xf32, #tpu.memory_space<vmem>>, vector<8x1xf32>
      tpu.vector_store %arg8[%c0_16, %c0_17], %51 {strides = array<i32>} : memref<8x1xf32, #tpu.memory_space<vmem>>, vector<8x1xf32>,
      %c0_18 = arith.constant 0 : index
      %c0_19 = arith.constant 0 : index
      %53 = vector.load %arg9[%c0_18, %c0_19] : memref<8x1xf32, #tpu.memory_space<vmem>>, vector<8x1xf32>
      %cst_20 = arith.constant dense<0.000000e+00> : vector<8xf32>
      %54 = vector.multi_reduction <add>, %47, %cst_20 [1] : vector<8x512xf32> to vector<8xf32>
      %55 = vector.shape_cast %54 : vector<8xf32> to vector<8x1xf32>
      %56 = arith.addf %53, %55 : vector<8x1xf32>
      %c0_21 = arith.constant 0 : index
      %c0_22 = arith.constant 0 : index
      %57 = vector.load %arg9[%c0_21, %c0_22] : memref<8x1xf32, #tpu.memory_space<vmem>>, vector<8x1xf32>
      tpu.vector_store %arg9[%c0_21, %c0_22], %56 {strides = array<i32>} : memref<8x1xf32, #tpu.memory_space<vmem>>, vector<8x1xf32>,
    } else {
    }
    %c1_i32_12 = arith.constant 1 : i32
    %44 = arith.cmpi eq, %arg0, %c1_i32_12 : i32
    %45 = arith.extui %44 : i1 to i32
    %c0_i32_13 = arith.constant 0 : i32
    %46 = arith.cmpi ne, %45, %c0_i32_13 : i32
    scf.if %46 {
      %c0_14 = arith.constant 0 : index
      %c0_15 = arith.constant 0 : index
      %47 = vector.load %arg11[%c0_14, %c0_15] : memref<8x1xf32, #tpu.memory_space<vmem>>, vector<8x1xf32>
      %48 = vector.broadcast %47 : vector<8x1xf32> to vector<8x512xf32>
      %49 = arith.addf %40, %48 : vector<8x512xf32>
      %c0_16 = arith.constant 0 : index
      %c0_17 = arith.constant 0 : index
      %c0_18 = arith.constant 0 : index
      %50 = vector.load %arg7[%c0_16, %c0_17, %c0_18] : memref<1x8x512xf32, #tpu.memory_space<vmem>>, vector<1x8x512xf32>
      %51 = vector.shape_cast %50 : vector<1x8x512xf32> to vector<8x512xf32>
      %52 = vector.shape_cast %49 : vector<8x512xf32> to vector<1x8x512xf32>
      tpu.vector_store %arg7[%c0_16, %c0_17, %c0_18], %52 {strides = array<i32>} : memref<1x8x512xf32, #tpu.memory_space<vmem>>, vector<1x8x512xf32>,
    } else {
    }
    return
  }
  func.func @transform_0(%arg0: i32, %arg1: i32, %arg2: i32) -> (i32, i32, i32) {
    %c0_i32 = arith.constant 0 : i32
    %c0_i32_0 = arith.constant 0 : i32
    %c0_i32_1 = arith.constant 0 : i32
    %c0_i32_2 = arith.constant 0 : i32
    return %c0_i32, %c0_i32_0, %c0_i32_1 : i32, i32, i32
  }
  func.func @transform_1(%arg0: i32, %arg1: i32, %arg2: i32) -> (i32, i32) {
    %c0_i32 = arith.constant 0 : i32
    %c0_i32_0 = arith.constant 0 : i32
    %c0_i32_1 = arith.constant 0 : i32
    return %c0_i32, %c0_i32_0 : i32, i32
  }
  func.func @transform_2(%arg0: i32, %arg1: i32, %arg2: i32) -> (i32, i32) {
    %c0_i32 = arith.constant 0 : i32
    %c0_i32_0 = arith.constant 0 : i32
    %c0_i32_1 = arith.constant 0 : i32
    return %c0_i32, %c0_i32_0 : i32, i32
  }
  func.func @transform_3(%arg0: i32, %arg1: i32, %arg2: i32) -> (i32, i32) {
    %c0_i32 = arith.constant 0 : i32
    %c0_i32_0 = arith.constant 0 : i32
    %c0_i32_1 = arith.constant 0 : i32
    return %c0_i32, %c0_i32_0 : i32, i32
  }
  func.func @transform_4(%arg0: i32, %arg1: i32, %arg2: i32) -> (i32, i32, i32) {
    %0 = arith.muli %arg0, %arg1 : i32
    %1 = arith.muli %arg0, %arg2 : i32
    %c0_i32 = arith.constant 0 : i32
    %c0_i32_0 = arith.constant 0 : i32
    return %0, %c0_i32, %1 : i32, i32, i32
  }
}

</mosaic_0001>

<bundles_post_ra>
// kernel: tpu_custom_call.1
= control target key start
LH: loop header
LB: loop body
LE: loop exit
PB: predicated region body
PF: predicated region fallthrough
CT: control target
= control target key end

     0   :  { %9 = vsyncpa [#allocation7], 0  ;;  %s1083_s0 = inlined_call_operand.hbm [shape: f32[2,4,512], index: 0, kind: input, shape index: {}]   ;;  %s1084_s1 = inlined_call_operand.vmem [shape: f32[8,4], index: 1, kind: input, shape index: {}]   ;;  %s1085_s2 = inlined_call_operand.vmem [shape: f32[8,1], index: 2, kind: input, shape index: {}]   ;;  %s1086_s3 = inlined_call_operand.vmem [shape: f32[8,1], index: 3, kind: input, shape index: {}]   ;;  %s1087_s4 = inlined_call_operand.hbm [shape: f32[2,8,512], index: 4, kind: output, shape index: {}]  }
   0x1   :  { %10 = vsyncpa [#allocation8], 0 }
   0x2   :  { %12 = vsyncpa [#allocation8 + $0x1], 0  ;;  %s888_s15 = smov 0   ;;  %s890_s16 = smov 0  }
   0x3   :  { %s892_s17 = smov 0   ;;  %s894_s18 = smov 0  }
   0x4   :  { %s896_s19 = smov 0   ;;  %s898_s20 = smov 0  }
   0x5   :  { %s900_s21 = smov 0   ;;  %s902_s22 = smov 0  }
   0x6 LB: > { %s604_s23 = sadd.s32 4294967295, %s850_s22   ;;  %s605_s24 = sadd.s32 4294967294, %s850_s22   ;;  %s850_s22 = sphi %s902_s22, %s18_s22   ;;  %s846_s21 = sphi %s900_s21, %s1107_s21   ;;  %s842_s20 = sphi %s898_s20, %s1106_s20   ;;  %s838_s19 = sphi %s896_s19, %s1105_s19   ;;  %s834_s18 = sphi %s894_s18, %s1104_s18   ;;  %s830_s17 = sphi %s892_s17, %s1103_s17   ;;  %s826_s16 = sphi %s890_s16, %s1102_s16   ;;  %s822_s15 = sphi %s888_s15, %s1101_s15  }
   0x7   : > { %s33_s25 = sadd.s32 1, %s842_s20  ;;  %s37_s26 = sadd.s32 1, %s846_s21 }
   0x8   : > { %p35_p0 = scmp.ge.s32.totalorder %s33_s25, 2  ;;  %s125_s27 = smul.u32 %s842_s20, %s846_s21 }
   0x9   : > { %s134_s28 = sadd.s32 1, %s830_s17  ;;  %p144_p1 = scmp.ne.s32.totalorder %s830_s17, %s826_s16 }
   0xa   : > { %s1109_s25 = smov (%p35_p0, %s33_s25), 0  ;;  %s1111_s26 = smov (!%p35_p0, %s37_s26), %s846_s21 }
   0xb   : > { %p145_p2 = scmp.eq.s32.totalorder %s604_s23, 3  ;;  %p150_p3 = scmp.ne.s32.totalorder %s826_s16, %s822_s15 }
   0xc   : > { %p39_p4 = scmp.ge.s32.totalorder %s1111_s26, 2  ;;  %p151_p5 = scmp.eq.s32.totalorder %s605_s24, 3 }
   0xd   : > { %p942_p6 = por %p145_p2, %p144_p1  ;;  %p606_p7 = scmp.ge.s32.totalorder %s850_s22, 1 }
   0xe   : > { %s1113_s26 = smov (%p39_p4, %s1111_s26), 0  ;;  %p949_p8 = por %p151_p5, %p150_p3 }
   0xf   : > { %s1092_s29 = scalar_select %p942_p6, 1, 0 }
  0x10   : > { %s1093_s30 = scalar_select %p949_p8, 1, 0 }
  0x11   : > { %p158_p9 = scmp.lt.s32.totalorder %s850_s22, 5  ;;  %s127_s5 = smul.u32 %s1113_s26, %s1109_s25 }
  0x12   : > { %p960_p11 = scmp.eq.s32.totalorder %s604_s23, 0  ;;  %s852_s9 = smov [#allocation6]  }
  0x13   : > { %p956_p10 = pnand %p606_p7, %p158_p9  ;;  %s129_s8 = ssub.s32 %s125_s27, %s127_s5 }
  0x14   : > { %s1095_s7 = scalar_select %p960_p11, 1, 0 }
  0x15   : > { %s1094_s6 = scalar_select %p956_p10, 1, 0 }
  0x16   : > { %p132_p12 = scmp.eq.s32.totalorder %s129_s8, 0  ;;  %p630_p13 = pneg %p956_p10 }
  0x17   : > { %s170_s10 = sshll.u32 %s852_s9, 4  ;;  %s724_s23 = scalar_lea.hbm %s1083_s0, 512  ;;  %s171_s10 = int_to_ptr.vmem [resolvable:$true] %s170_s10 }
  0x18   : > { %s967_s11 = scalar_select %p132_p12, %s830_s17, %s134_s28  }
  0x19   : > { %p971_p0 = pnand %p960_p11, %p630_p13  ;;  %p725_p1 = scmp.ne.s32.totalorder %s1083_s0, %s724_s23 }
  0x1a   : > { %p731_p5 = scmp.lt.u32.totalorder %s724_s23, %s1083_s0 }
  0x1b   : > { %p726_p2 = pneg %p971_p0 }
  0x1d   : > { %p727_p3 = pnand %p726_p2, %p725_p1 }
  0x1f   : > { %p728_p4 = pneg %p727_p3 }
  0x21   : > { %p733_p7 = pnand %p731_p5, %p728_p4 }
  0x23   : > { %736 = shalt.err (!%p733_p7)
}
  0x24   : > { %s737_s8 = scalar_lea.vmem %s171_s10, 512  ;;  %p745_p8 = scmp.lt.s32.totalorder %s171_s10, %s171_s10 }
  0x25   : > { %p738_p9 = scmp.ne.s32.totalorder %s171_s10, %s737_s8  ;;  %p746_p6 = scmp.lt.s32.totalorder %s737_s8, %s737_s8 }
  0x27   : > { %p740_p12 = pnand %p738_p9, %p726_p2  ;;  %p747_p11 = por %p746_p6, %p745_p8 }
  0x29   : > { %p741_p13 = pneg %p740_p12 }
  0x2b   : > { %p748_p10 = pnand %p747_p11, %p741_p13 }
  0x2d   : > { %751 = shalt.err (!%p748_p10)
}
  0x2e   : > { %s853_s9 = smov 256   ;;  %s854_s13 = smov 16  }
  0x2f   : > { %633 = dma.hbm_to_vmem [thread:$0]  (!%p971_p0), %s1083_s0, 512, %s171_s10, [#allocation7], %s853_s9, %s853_s9, %s854_s13  }
  0x30   : > { %p1097_p1 = scmp.ne.s32.totalorder %s1094_s6, 0 }
  0x31   : > { %p1098_p3 = scmp.ne.s32.totalorder (!%p1097_p1), %s1095_s7, 0 }
  0x32   : > { %195 = sbr.rel (%p1097_p1) target bundleno = 693 (0x2b5), region = 36 }
  0x39   : > { %813 = dma.done.wait (%p1098_p3), [#allocation7], 512  }
  0x3a   : > { %815 = vsyncadd (%p1098_p3), [#allocation7], 4294966784  ;;  %s213_s23 = sand.u32 1, %s826_s16   ;;  %p219_p6 = scmp.eq.s32.totalorder %s834_s18, 0  ;;  %v223_v0 = vld [vmem:[%s1084_s1] sm:$0xff] }
  0x3b   : > { %s610_s12 = sshll.u32 %s213_s23, 5  ;;  %p224_p8 = scmp.eq.s32.totalorder %s838_s19, 0 }
  0x3c   : > { %s1007_s27 = scalar_lea.vmem [#allocation9], %s610_s12 }
  0x3d   : > { %p225_p10 = pnand %p224_p8, %p219_p6 }
  0x3e   : > { %vm229_vm0 = vcmask (!%p225_p10), 7168   ;;  %vm232_vm1 = vcmask (!%p225_p10), 31744   ;;  %v855_v1 = vmov (!%p225_p10), 0.0  }
  0x3f   : > { %228 = sbr.rel (%p225_p10) target bundleno = 70 (0x46), region = 44  ;;  %230 = vst.msk [vmem:[#allocation2] sm:$0xff] (!%p225_p10), %vm229_vm0, %v855_v1  ;;  %231 = vst.msk [vmem:[#allocation3] sm:$0xff] (!%p225_p10), %vm229_vm0, %v855_v1 }
  0x40   : > { %234 = vst.msk [vmem:[#allocation5] sm:$0xff] (!%p225_p10), %vm229_vm0, %v855_v1 }
  0x41   : > { %233 = vst.msk [vmem:[#allocation4] sm:$0xff] (!%p225_p10), %vm232_vm1, %v223_v0 }
  0x46 PF: > { %p235_p11 = scmp.eq.s32.totalorder %s838_s19, 1 }
  0x48   : > { %p236_p0 = pnand %p235_p11, %p219_p6 }
  0x49   : > { %v240_v2 = vld [vmem:[#allocation2] sm:$0xff] (!%p236_p0)  ;;  %v243_v3 = vld [vmem:[#allocation3] sm:$0xff] (!%p236_p0)  ;;  %v856_v4 = vmov (!%p236_p0), 0   ;;  %vm263_vm2 = vcmask (!%p236_p0), 7168   ;;  %vm258_vm3 = vcmask (!%p236_p0), 31744  }
  0x4a   : > { %239 = sbr.rel (%p236_p0) target bundleno = 228 (0xe4), region = 48  ;;  %715 = vset.pattern.permute.xlu0 (!%p236_p0), %v856_v4  ;;  %v242_v5 = vmul.f32 (!%p236_p0), 0.0009765625, %v240_v2  ;;  %v244_v6 = vmul.f32 (!%p236_p0), 0.0009765625, %v243_v3  ;;  %v248_v11 = vld [vmem:[%s1085_s2] sm:$0xff] (!%p236_p0) }
  0x4b   : > { %v260_v14 = vld [vmem:[%s1086_s3] sm:$0xff] (!%p236_p0) }
  0x4c   : > { %v245_v7 = vmul.f32 (!%p236_p0), %v242_v5, %v242_v5 }
  0x4e   : > { %v246_v8 = vsub.f32 (!%p236_p0), %v244_v6, %v245_v7 }
  0x50   : > { %v247_v9 = vmax.f32 (!%p236_p0), %v246_v8, 0.0 }
  0x52   : > { %v249_v10 = vadd.f32 1e-05, %v247_v9 }
  0x54   : > { %716 = vrsqrt.f32 %v249_v10 }
  0x5e   : > { %v717_v12 = vpop.eup %716 }
  0x5f   : > { %v251_v13 = vmul.f32 %v717_v12, %v248_v11 }
  0x61   : > { %254 = vperm.xlu0 %715, %v251_v13   ;;  %v261_v15 = vmul.f32 %v251_v13, %v242_v5 }
  0x63   : > { %v262_v16 = vsub.f32 %v260_v14, %v261_v15 }
  0x65   : > { %264 = vst.msk [vmem:[#allocation5] sm:$0xff] %vm263_vm2, %v262_v16 }
  0xe0   : > { %v255_v17 = vpop.permute.xlu0 %254 }
  0xe1   : > { %v257_v18 = vmul.f32 %v255_v17, %v223_v0 }
  0xe3   : > { %259 = vst.msk [vmem:[#allocation4] sm:$0xff] %vm258_vm3, %v257_v18 }
  0xe4 PF: > { %s271_s9 = scalar_select %p235_p11, 1, 0  ;;  %v857_v19 = vmov 0   ;;  %v858_v21 = vmov 2   ;;  %v859_v24 = vmov 1   ;;  %v860_v25 = vmov 3  }
  0xe5   : > { %718 = vset.pattern.permute.xlu0 %v857_v19  ;;  %720 = vset.pattern.permute.xlu1 %v858_v21  ;;  %v282_v26 = vlaneseq  ;;  %s622_s13 = sshll.u32 %s834_s18, 4  ;;  %p614_p2 = scmp.ne.s32.totalorder %s838_s19, 0 }
  0xe6   : > { %v272_v22 = vstv %s271_s9  ;;  %s267_s14 = scalar_lea.vmem [#allocation6], %s622_s13  ;;  %vm480_vm5 = vcmask (!%p614_p2), 7168  }
  0xe7   : > { %vm273_vm4 = vcmp.eq.s32.totalorder %v272_v22, 1  ;;  %v283_v27 = vshrl.u32 %v282_v26, 7  ;;  %v268_v30 = vld [vmem:[%s267_s14] sm:$0xff]  ;;  %v269_v31 = vld [vmem:[%s267_s14 + $0x8] sm:$0xff] }
  0xe9   : > { %v284_v28 = vsub.s32 0, %v283_v27  ;;  %v288_v29 = vsub.s32 4, %v283_v27  ;;  %v376_v32 = vsub.s32 2, %v283_v27  ;;  %v380_v33 = vsub.s32 6, %v283_v27 }
  0xea   : > { %v270_v20 = vld [vmem:[#allocation4] sm:$0xff]  ;;  %v328_v34 = vsub.s32 1, %v283_v27  ;;  %v332_v35 = vsub.s32 5, %v283_v27  ;;  %v424_v36 = vsub.s32 3, %v283_v27  ;;  %v428_v37 = vsub.s32 7, %v283_v27 }
  0xeb   : > { %v274_v23 = vsel %vm273_vm4, %v270_v20, %v223_v0  ;;  %v285_v38 = vrot.slane %v268_v30, %v284_v28  ;;  %v289_v39 = vrot.slane %v268_v30, %v288_v29  ;;  %v293_v40 = vrot.slane %v269_v31, %v284_v28 }
  0xec   : > { %277 = vperm.xlu0 %718, %v274_v23   ;;  %371 = vperm.xlu1 %720, %v274_v23   ;;  %v297_v41 = vrot.slane %v269_v31, %v288_v29  ;;  %v377_v42 = vrot.slane %v268_v30, %v376_v32  ;;  %v381_v43 = vrot.slane %v268_v30, %v380_v33 }
  0xed   : > { %v385_v44 = vrot.slane %v269_v31, %v376_v32  ;;  %v389_v45 = vrot.slane %v269_v31, %v380_v33  ;;  %v329_v46 = vrot.slane %v268_v30, %v328_v34  ;;  %v333_v47 = vrot.slane %v268_v30, %v332_v35 }
  0xee   : > { %v337_v48 = vrot.slane %v269_v31, %v328_v34  ;;  %v341_v49 = vrot.slane %v269_v31, %v332_v35  ;;  %v425_v50 = vrot.slane %v268_v30, %v424_v36  ;;  %v429_v51 = vrot.slane %v268_v30, %v428_v37 }
  0xef   : > { %v433_v52 = vrot.slane %v269_v31, %v424_v36  ;;  %v437_v53 = vrot.slane %v269_v31, %v428_v37  ;;  %v305_v55 = vrot.slane %v285_v38, %v284_v28  ;;  %v309_v56 = vrot.slane %v289_v39, %v284_v28 }
  0xf0   : > { %719 = vset.pattern.permute.xlu0 %v859_v24  ;;  %721 = vset.pattern.permute.xlu1 %v860_v25  ;;  %v313_v57 = vrot.slane %v293_v40, %v284_v28  ;;  %v317_v58 = vrot.slane %v297_v41, %v284_v28  ;;  %v397_v60 = vrot.slane %v377_v42, %v376_v32 }
  0xf1   : > { %323 = vperm.xlu0 %719, %v274_v23   ;;  %419 = vperm.xlu1 %721, %v274_v23   ;;  %v401_v61 = vrot.slane %v381_v43, %v376_v32  ;;  %v405_v62 = vrot.slane %v385_v44, %v376_v32  ;;  %v409_v63 = vrot.slane %v389_v45, %v376_v32 }
  0xf2   : > { %v349_v0 = vrot.slane %v329_v46, %v328_v34  ;;  %v353_v1 = vrot.slane %v333_v47, %v328_v34  ;;  %v357_v2 = vrot.slane %v337_v48, %v328_v34  ;;  %v361_v3 = vrot.slane %v341_v49, %v328_v34  ;;  %v473_v48 = vld [vmem:[#allocation2] sm:$0xff] (!%p614_p2) }
  0xf3   : > { %v445_v4 = vrot.slane %v425_v50, %v424_v36  ;;  %v449_v5 = vrot.slane %v429_v51, %v424_v36  ;;  %v453_v6 = vrot.slane %v433_v52, %v424_v36  ;;  %v457_v7 = vrot.slane %v437_v53, %v424_v36  ;;  %v482_v51 = vld [vmem:[#allocation3] sm:$0xff] (!%p614_p2) }
  0xf5   : > { %722 = vset.pattern.permute.xlu0 %v860_v25 }
 0x16b   : > { %v278_v54 = vpop.permute.xlu0 %277  ;;  %v372_v59 = vpop.permute.xlu1 %371 }
 0x16c   : > { %v318_v8 = vmul.f32 %v305_v55, %v278_v54  ;;  %v319_v9 = vmul.f32 %v309_v56, %v278_v54  ;;  %v320_v10 = vmul.f32 %v313_v57, %v278_v54  ;;  %v321_v11 = vmul.f32 %v317_v58, %v278_v54 }
 0x16d   : > { %v410_v12 = vmul.f32 %v397_v60, %v372_v59  ;;  %v411_v13 = vmul.f32 %v401_v61, %v372_v59  ;;  %v412_v14 = vmul.f32 %v405_v62, %v372_v59  ;;  %v413_v15 = vmul.f32 %v409_v63, %v372_v59 }
 0x170   : > { %v324_v16 = vpop.permute.xlu0 %323  ;;  %v420_v17 = vpop.permute.xlu1 %419 }
 0x171   : > { %v362_v18 = vmul.f32 %v349_v0, %v324_v16  ;;  %v363_v19 = vmul.f32 %v353_v1, %v324_v16  ;;  %v364_v20 = vmul.f32 %v357_v2, %v324_v16  ;;  %v365_v21 = vmul.f32 %v361_v3, %v324_v16  ;;  %468 = sbr.rel (%p614_p2) target bundleno = 532 (0x214), region = 52 }
 0x172   : > { %v458_v22 = vmul.f32 %v445_v4, %v420_v17  ;;  %v459_v23 = vmul.f32 %v449_v5, %v420_v17  ;;  %v460_v24 = vmul.f32 %v453_v6, %v420_v17  ;;  %v461_v25 = vmul.f32 %v457_v7, %v420_v17 }
 0x173   : > { %v366_v26 = vadd.f32 %v362_v18, %v318_v8  ;;  %v367_v27 = vadd.f32 %v363_v19, %v319_v9  ;;  %v368_v28 = vadd.f32 %v364_v20, %v320_v10  ;;  %v369_v29 = vadd.f32 %v365_v21, %v321_v11 }
 0x175   : > { %v414_v30 = vadd.f32 %v410_v12, %v366_v26  ;;  %v415_v31 = vadd.f32 %v411_v13, %v367_v27  ;;  %v416_v32 = vadd.f32 %v412_v14, %v368_v28  ;;  %v417_v33 = vadd.f32 %v413_v15, %v369_v29 }
 0x177   : > { %v462_v34 = vadd.f32 %v458_v22, %v414_v30  ;;  %v463_v35 = vadd.f32 %v459_v23, %v415_v31  ;;  %v464_v36 = vadd.f32 %v460_v24, %v416_v32  ;;  %v465_v37 = vadd.f32 %v461_v25, %v417_v33 }
 0x179   : > { %v474_v38 = vadd.f32 %v463_v35, %v462_v34  ;;  %v469_v39 = vmul.f32 %v462_v34, %v462_v34  ;;  %v470_v40 = vmul.f32 %v463_v35, %v463_v35  ;;  %v471_v41 = vmul.f32 %v464_v36, %v464_v36 }
 0x17a   : > { %v472_v43 = vmul.f32 %v465_v37, %v465_v37 }
 0x17b   : > { %v475_v42 = vadd.f32 %v474_v38, %v464_v36  ;;  %v483_v44 = vadd.f32 %v470_v40, %v469_v39 }
 0x17d   : > { %v476_v45 = vadd.f32 %v475_v42, %v465_v37  ;;  %v484_v46 = vadd.f32 %v483_v44, %v471_v41 }
 0x17f   : > { %477 = vadd.xlane.f32.xlu0 %v476_v45  ;;  %v485_v47 = vadd.f32 %v484_v46, %v472_v43 }
 0x183   : > { %486 = vadd.xlane.f32.xlu0 %v485_v47 }
 0x20c   : > { %v478_v49 = vpop.xlane.xlu0 %477 }
 0x20d   : > { %v479_v50 = vadd.f32 %v478_v49, %v473_v48 }
 0x20f   : > { %481 = vst.msk [vmem:[#allocation2] sm:$0xff] %vm480_vm5, %v479_v50 }
 0x210   : > { %v487_v52 = vpop.xlane.xlu0 %486 }
 0x211   : > { %v488_v53 = vadd.f32 %v487_v52, %v482_v51 }
 0x213   : > { %489 = vst.msk [vmem:[#allocation3] sm:$0xff] %vm480_vm5, %v488_v53 }
 0x214 PF: > { %p615_p4 = scmp.ne.s32.totalorder %s838_s19, 1 }
 0x215   : > { %v493_v54 = vld [vmem:[#allocation5] sm:$0xff] (!%p615_p4)  ;;  %v861_v55 = vmov (!%p615_p4), 0  }
 0x216   : > { %492 = sbr.rel (%p615_p4) target bundleno = 667 (0x29b), region = 56  ;;  %723 = vset.pattern.permute.xlu0 (!%p615_p4), %v861_v55 }
 0x217   : > { %496 = vperm.xlu0 (!%p615_p4), %723, %v493_v54  }
 0x296   : > { %v497_v56 = vpop.permute.xlu0 %496 }
 0x297   : > { %v499_v57 = vadd.f32 %v497_v56, %v462_v34  ;;  %v500_v58 = vadd.f32 %v497_v56, %v463_v35  ;;  %v501_v59 = vadd.f32 %v497_v56, %v464_v36  ;;  %v502_v60 = vadd.f32 %v497_v56, %v465_v37 }
 0x299   : > { %503 = vst [vmem:[%s1007_s27] sm:$0xff] %v499_v57  ;;  %504 = vst [vmem:[%s1007_s27 + $0x8] sm:$0xff] %v500_v58 }
 0x29a   : > { %505 = vst [vmem:[%s1007_s27 + $0x10] sm:$0xff] %v501_v59  ;;  %506 = vst [vmem:[%s1007_s27 + $0x18] sm:$0xff] %v502_v60 }
 0x29b PF: > { %s515_s24 = smul.u32 %s834_s18, %s838_s19  ;;  %s526_s12 = sshll.u32 %s1007_s27, 4  ;;  %s1032_s12 = int_to_ptr.vmem [resolvable:$true] %s526_s12 }
 0x29c   : > { %s508_s5 = scalar_lea.sflag [#allocation8], %s213_s23  ;;  %s752_s8 = scalar_lea.vmem %s1032_s12, 512 }
 0x29d   : > { %s623_s6 = sshll.u32 %s515_s24, 9  ;;  %p753_p5 = scmp.ne.s32.totalorder %s1032_s12, %s752_s8 }
 0x29e   : > { %s524_s28 = scalar_lea.hbm %s1087_s4, %s623_s6  ;;  %p1099_p7 = scmp.ne.s32.totalorder %s1092_s29, 0 }
 0x29f   : > { %s862_s9 = smov [#allocation9]  }
 0x2a0   : > { %p754_p9 = pnand %p753_p5, %p1099_p7  ;;  %s756_s18 = sshll.u32 %s862_s9, 4  ;;  %s757_s18 = int_to_ptr.vmem [resolvable:$false] %s756_s18 }
 0x2a1   : > { %s758_s19 = scalar_lea.vmem %s757_s18, 1024  ;;  %p759_p13 = scmp.lt.s32.totalorder %s1032_s12, %s757_s18 }
 0x2a2   : > { %p755_p12 = pneg %p754_p9  ;;  %p760_p1 = scmp.lt.s32.totalorder %s758_s19, %s752_s8 }
 0x2a4   : > { %p761_p3 = por %p760_p1, %p759_p13 }
 0x2a6   : > { %p762_p6 = pnand %p761_p3, %p755_p12 }
 0x2a8   : > { %765 = shalt.err (!%p762_p6)
}
 0x2a9   : > { %s766_s27 = scalar_lea.hbm %s524_s28, 512  ;;  %s770_s14 = scalar_lea.hbm %s1087_s4, 1024 }
 0x2aa   : > { %p767_p8 = scmp.ne.s32.totalorder %s524_s28, %s766_s27  ;;  %p771_p0 = scmp.lt.u32.totalorder %s524_s28, %s1087_s4 }
 0x2ab   : > { %p772_p2 = scmp.lt.u32.totalorder %s770_s14, %s766_s27  ;;  %p774_p5 = scmp.lt.u32.totalorder %s766_s27, %s524_s28 }
 0x2ac   : > { %p768_p10 = pnand %p767_p8, %p1099_p7 }
 0x2ad   : > { %p773_p4 = por %p772_p2, %p771_p0 }
 0x2ae   : > { %p769_p11 = pneg %p768_p10 }
 0x2af   : > { %p775_p9 = por %p774_p5, %p773_p4 }
 0x2b1   : > { %p776_p12 = pnand %p775_p9, %p769_p11 }
 0x2b3   : > { %779 = shalt.err (!%p776_p12)
}
 0x2b4   : > { %628 = dma.vmem_to_hbm [thread:$0]  (%p1099_p7), %s1032_s12, 512, %s524_s28, %s508_s5  }
 0x2b5 PF: > { %p640_p13 = scmp.ge.s32.totalorder %s850_s22, 2  ;;  %s538_s10 = sand.u32 1, %s822_s15  }
 0x2b6   : > { %p1100_p1 = scmp.ne.s32.totalorder %s1093_s30, 0  ;;  %s539_s7 = scalar_lea.sflag [#allocation8], %s538_s10 }
 0x2b8   : > { %p635_p3 = pnand %p640_p13, %p1100_p1 }
 0x2ba   : > { %817 = dma.done.wait (!%p635_p3), %s539_s7, 512  }
 0x2bb   : > { %819 = vsyncadd (!%p635_p3), %s539_s7, 4294966784  ;;  %s18_s22 = sadd.s32 1, %s850_s22   ;;  %s1101_s15 = smov %s826_s16 }
 0x2bc   : > { %p15_p6 = scmp.ge.s32.totalorder %s18_s22, 6   ;;  %s1102_s16 = smov %s830_s17 }
 0x2bd   : > { %s1103_s17 = smov %s967_s11  ;;  %s1104_s18 = smov %s842_s20 }
 0x2be   : > { %s1105_s19 = smov %s846_s21  ;;  %s1106_s20 = smov %s1109_s25 }
 0x2bf   : > { %s1107_s21 = smov %s1113_s26  ;;  %17 = sbr.rel (!%p15_p6) target bundleno = 6 (0x6), region = 90 }
 0x2c6   :  { %544 = vsyncpa [#allocation7], 1 }
 0x2c7   :  { %546 = vsyncpa [#allocation7 + $0x1], 1 }
 0x2c8   :  { %547 = vsyncpa [#allocation8], 1 }
 0x2c9   :  { %549 = vsyncpa [#allocation8 + $0x1], 1 }

</bundles_post_ra>
